<compile_context>
chip_gen: v6e
topology: v6e:2x2x1
jax: 0.10.0
libtpu: 0.0.40
codegen_flags: <defaults>
</compile_context>

<pallas_src>
import functools

import jax
import jax.numpy as jnp
from jax import lax
from jax.experimental import pallas as pl
from jax.experimental.pallas import tpu as pltpu


def _round_up(a, b):
    return (a + b - 1) // b * b


def _vmem_budget():
    """Returns (tile_budget_bytes, vmem_limit_bytes), conservative on v7x."""
    cap = 64 << 20
    try:
        cap = int(pltpu.get_tpu_info().vmem_capacity_bytes)
    except Exception:
        pass
    try:
        # TODO(synk): replace with an explicit per-TensorCore query once
        # get_tpu_info is guaranteed to report per-TC VMEM on v7x; this guards
        # against a per-chip (2x) report on the 64 MiB/TC generation.
        if "7" in jax.devices()[0].device_kind:
            cap = min(cap, 64 << 20)
    except Exception:
        pass
    vmem_limit = max(40 << 20, min(cap * 3 // 4, 96 << 20))
    budget = vmem_limit - (16 << 20)
    return budget, vmem_limit


# --------------------------------------------------------------------------
# Kernels
# --------------------------------------------------------------------------
def _make_row_kernel(power):
    """2-D block (rows, D): reduce over lanes (axis 1), scale in place."""
    def kernel(x_ref, o_ref):
        xv = x_ref[...]
        xf = xv.astype(jnp.float32)
        if power == 2:
            inv = lax.rsqrt(jnp.sum(xf * xf, axis=1, keepdims=True))
        else:
            inv = jnp.sum(xf ** power, axis=1, keepdims=True) ** (-1.0 / power)
        o_ref[...] = (xv * inv.astype(xv.dtype)).astype(o_ref.dtype)
    return kernel


def _make_axis1_kernel(power):
    """3-D block (1, C, M): reduce over sublanes (axis 1), scale in place."""
    def kernel(x_ref, o_ref):
        xv = x_ref[...]
        xf = xv.astype(jnp.float32)
        if power == 2:
            inv = lax.rsqrt(jnp.sum(xf * xf, axis=1, keepdims=True))
        else:
            inv = jnp.sum(xf ** power, axis=1, keepdims=True) ** (-1.0 / power)
        o_ref[...] = (xv * inv.astype(xv.dtype)).astype(o_ref.dtype)
    return kernel


def _make_row_reduce_kernel(power, d_total, block_d):
    """Chunked-D pass 1: accumulate sum(x^p) over D chunks, finalize to 1/norm."""
    def kernel(x_ref, inv_ref):
        k = pl.program_id(1)

        @pl.when(k == 0)
        def _():
            inv_ref[...] = jnp.zeros_like(inv_ref)

        xf = x_ref[...].astype(jnp.float32)
        # Mask out-of-bounds lanes of a ragged last D chunk (reads are padded
        # with unspecified data, which must not pollute the sum).
        col = lax.broadcasted_iota(jnp.int32, xf.shape, 1) + k * block_d
        xf = jnp.where(col < d_total, xf, 0.0)
        if power == 2:
            inv_ref[...] += jnp.sum(xf * xf, axis=1, keepdims=True)
        else:
            inv_ref[...] += jnp.sum(xf ** power, axis=1, keepdims=True)

        @pl.when(k == pl.num_programs(1) - 1)
        def _():
            if power == 2:
                inv_ref[...] = lax.rsqrt(inv_ref[...])
            else:
                inv_ref[...] = inv_ref[...] ** (-1.0 / power)
    return kernel


def _scale_kernel(x_ref, inv_ref, o_ref):
    """Chunked-D pass 2: out = x * inv (inv broadcast over the D chunk)."""
    xv = x_ref[...]
    o_ref[...] = (xv * inv_ref[...].astype(xv.dtype)).astype(o_ref.dtype)


# --------------------------------------------------------------------------
# Wrappers
# --------------------------------------------------------------------------
def _normalize_2d(x2, power):
    n, d = x2.shape
    itemsize = jnp.dtype(x2.dtype).itemsize
    sub = max(8, 32 // itemsize)             # sublane multiple: 8/16/32
    budget, vmem_limit = _vmem_budget()

    # Honest footprint: 2x double-buffered (in + out) tiles + f32 temporaries.
    per_row = 4 * d * itemsize + 8 * d

    if per_row * sub <= budget:
        # Single pass: full feature axis resident, large row tiles.
        block_rows = max(sub, budget // per_row // sub * sub)
        block_rows = min(block_rows, _round_up(n, sub))
        return pl.pallas_call(
            _make_row_kernel(power),
            out_shape=jax.ShapeDtypeStruct((n, d), x2.dtype),
            grid_spec=pltpu.PrefetchScalarGridSpec(
                num_scalar_prefetch=0,
                grid=(pl.cdiv(n, block_rows),),
                in_specs=[pl.BlockSpec((block_rows, d), lambda i: (i, 0))],
                out_specs=pl.BlockSpec((block_rows, d), lambda i: (i, 0)),
            ),
            compiler_params=pltpu.CompilerParams(
                # TODO(synk): use CORE_PARALLEL on v7x to force the 2-TC split.
                dimension_semantics=("parallel",),
                vmem_limit_bytes=vmem_limit,
            ),
        )(x2)

    # Chunked-D fallback (very large D): pass 1 reduces, pass 2 scales.
    block_rows = _round_up(min(256, _round_up(n, sub)), sub)
    per_col = block_rows * (4 * itemsize + 8)
    block_d = max(128, budget // per_col // 128 * 128)
    block_d = min(block_d, _round_up(d, 128))
    grid = (pl.cdiv(n, block_rows), pl.cdiv(d, block_d))

    inv = pl.pallas_call(
        _make_row_reduce_kernel(power, d, block_d),
        out_shape=jax.ShapeDtypeStruct((n, 1), jnp.float32),
        grid_spec=pltpu.PrefetchScalarGridSpec(
            num_scalar_prefetch=0,
            grid=grid,
            in_specs=[pl.BlockSpec((block_rows, block_d), lambda i, k: (i, k))],
            out_specs=pl.BlockSpec((block_rows, 1), lambda i, k: (i, 0)),
        ),
        compiler_params=pltpu.CompilerParams(
            dimension_semantics=("parallel", "arbitrary"),
            vmem_limit_bytes=vmem_limit,
        ),
    )(x2)

    return pl.pallas_call(
        _scale_kernel,
        out_shape=jax.ShapeDtypeStruct((n, d), x2.dtype),
        grid_spec=pltpu.PrefetchScalarGridSpec(
            num_scalar_prefetch=0,
            grid=grid,
            in_specs=[pl.BlockSpec((block_rows, block_d), lambda i, k: (i, k)),
                      pl.BlockSpec((block_rows, 1), lambda i, k: (i, 0))],
            out_specs=pl.BlockSpec((block_rows, block_d), lambda i, k: (i, k)),
        ),
        compiler_params=pltpu.CompilerParams(
            dimension_semantics=("parallel", "parallel"),
            vmem_limit_bytes=vmem_limit,
        ),
    )(x2, inv)


def _normalize_axis1(x, power):
    """N-D input (B, C, *rest): reduce over axis 1 without any transpose."""
    shape = x.shape
    b_dim, c_dim = shape[0], shape[1]
    m_dim = 1
    for s in shape[2:]:
        m_dim *= s
    x3 = x.reshape(b_dim, c_dim, m_dim)      # contiguous => metadata-only
    itemsize = jnp.dtype(x.dtype).itemsize
    budget, vmem_limit = _vmem_budget()

    # Per lane-column bytes: in/out double buffers + f32 temporaries.
    per_col = c_dim * (4 * itemsize + 8)
    if m_dim <= 128:
        block_m = m_dim
    else:
        block_m = max(128, budget // per_col // 128 * 128)
        block_m = min(block_m, _round_up(m_dim, 128))
    # TODO(synk): chunk the channel axis too if C alone overflows the budget.

    out3 = pl.pallas_call(
        _make_axis1_kernel(power),
        out_shape=jax.ShapeDtypeStruct((b_dim, c_dim, m_dim), x.dtype),
        grid_spec=pltpu.PrefetchScalarGridSpec(
            num_scalar_prefetch=0,
            grid=(b_dim, pl.cdiv(m_dim, block_m)),
            in_specs=[pl.BlockSpec((1, c_dim, block_m), lambda b, m: (b, 0, m))],
            out_specs=pl.BlockSpec((1, c_dim, block_m), lambda b, m: (b, 0, m)),
        ),
        compiler_params=pltpu.CompilerParams(
            dimension_semantics=("parallel", "parallel"),
            vmem_limit_bytes=vmem_limit,
        ),
    )(x3)
    return out3.reshape(shape)


@functools.partial(jax.jit, static_argnames=("power",))
def normalize(x, power=2):
    """L_p normalization along axis 1 (PyTorch Normalize forward)."""
    if x.ndim == 2:
        return _normalize_2d(x, power)
    return _normalize_axis1(x, power)


def normalize_ref(x, power=2):
    """Pure-JAX reference matching the PyTorch module."""
    norm = jnp.sum(x ** power, axis=1, keepdims=True) ** (1.0 / power)
    return x / norm


if __name__ == "__main__":
    key = jax.random.PRNGKey(0)
    k1, k2 = jax.random.split(key)

    # Embedding-style 2-D input: batch=16, hidden=32.
    x = jax.random.normal(k1, (16, 32), dtype=jnp.float32)
    out = jax.block_until_ready(normalize(x))
    ref = normalize_ref(x)
    assert out.shape == x.shape and out.dtype == x.dtype
    assert jnp.allclose(out, ref, atol=1e-5, rtol=1e-4), "2-D mismatch vs reference"

    # 4-D input [B, C, H, W] exercising the general axis-1 path (no transpose).
    x4 = jax.random.normal(k2, (2, 8, 16, 16), dtype=jnp.float32)
    out4 = jax.block_until_ready(normalize(x4))
    ref4 = normalize_ref(x4)
    assert out4.shape == x4.shape and out4.dtype == x4.dtype
    assert jnp.allclose(out4, ref4, atol=1e-5, rtol=1e-4), "4-D mismatch vs reference"

    print("KERNEL_OK")
</pallas_src>

<mosaic_0001>
module attributes {stable_mosaic.version = 11 : i64} {
  func.func @kernel(%arg0: i32, %arg1: memref<16x32xf32, #tpu.memory_space<vmem>>, %arg2: memref<16x32xf32, #tpu.memory_space<vmem>>) attributes {dimension_semantics = [#tpu.dimension_semantics<parallel>], iteration_bounds = array<i64: 1>, scalar_prefetch = 0 : i64, scratch_operands = 0 : i64, tpu.core_type = #tpu.core_type<tc>, window_params = [{transform_indices = @transform_0, window_bounds = array<i64: 16, 32>}, {transform_indices = @transform_1, window_bounds = array<i64: 16, 32>}]} {
    %c0 = arith.constant 0 : index
    %c0_0 = arith.constant 0 : index
    %0 = vector.load %arg1[%c0, %c0_0] : memref<16x32xf32, #tpu.memory_space<vmem>>, vector<16x32xf32>
    %1 = arith.mulf %0, %0 : vector<16x32xf32>
    %cst = arith.constant dense<0.000000e+00> : vector<16xf32>
    %2 = vector.multi_reduction <add>, %1, %cst [1] : vector<16x32xf32> to vector<16xf32>
    %3 = vector.shape_cast %2 : vector<16xf32> to vector<16x1xf32>
    %4 = math.rsqrt %3 : vector<16x1xf32>
    %5 = vector.broadcast %4 : vector<16x1xf32> to vector<16x32xf32>
    %6 = arith.mulf %0, %5 : vector<16x32xf32>
    %c0_1 = arith.constant 0 : index
    %c0_2 = arith.constant 0 : index
    %7 = vector.load %arg2[%c0_1, %c0_2] : memref<16x32xf32, #tpu.memory_space<vmem>>, vector<16x32xf32>
    tpu.vector_store %arg2[%c0_1, %c0_2], %6 {strides = array<i32>} : memref<16x32xf32, #tpu.memory_space<vmem>>, vector<16x32xf32>,
    return
  }
  func.func @transform_0(%arg0: i32) -> (i32, i32) {
    %c0_i32 = arith.constant 0 : i32
    %c0_i32_0 = arith.constant 0 : i32
    return %arg0, %c0_i32 : i32, i32
  }
  func.func @transform_1(%arg0: i32) -> (i32, i32) {
    %c0_i32 = arith.constant 0 : i32
    %c0_i32_0 = arith.constant 0 : i32
    return %arg0, %c0_i32 : i32, i32
  }
}

</mosaic_0001>

<bundles_post_ra>
// kernel: normalize.1
= control target key start
LH: loop header
LB: loop body
LE: loop exit
PB: predicated region body
PF: predicated region fallthrough
CT: control target
= control target key end

     0   :  { %6 = vsyncpa [#allocation3], 0  ;;  %s139_s0 = inlined_call_operand.hbm [shape: f32[16,32], index: 0, kind: input, shape index: {}]   ;;  %s140_s1 = inlined_call_operand.hbm [shape: f32[16,32], index: 1, kind: output, shape index: {}]  }
   0x1   :  { %7 = vsyncpa [#allocation4], 0  ;;  %s109_s6 = smov [#allocation2]  }
   0x2   :  { %s13_s7 = sshll.u32 %s109_s6, 4  ;;  %s14_s7 = int_to_ptr.vmem [resolvable:$true] %s13_s7 }
   0x3   :  { %s73_s8 = scalar_lea.vmem %s14_s7, 256  ;;  %p78_p1 = scmp.lt.s32.totalorder %s14_s7, %s14_s7 }
   0x4   :  { %p74_p0 = scmp.ne.s32.totalorder %s14_s7, %s73_s8  ;;  %p79_p2 = scmp.lt.s32.totalorder %s73_s8, %s73_s8 }
   0x6   :  { %p80_p3 = por %p79_p2, %p78_p1 }
   0x8   :  { %p81_p4 = pnand %p80_p3, %p74_p0 }
   0xa   :  { %84 = shalt.err (!%p81_p4)
}
   0xb   :  { %s110_s9 = smov 128   ;;  %s111_s10 = smov 8  }
   0xc   :  { %19 = dma.hbm_to_vmem [thread:$0]  %s139_s0, 256, %s14_s7, [#allocation3], %s110_s9, %s110_s9, %s111_s10  }
   0xd   :  { %105 = dma.done.wait [#allocation3], 256  }
   0xe   :  { %106 = vsyncadd [#allocation3], 4294967040  ;;  %v23_v0 = vld [vmem:[#allocation2] sm:$0xff]  ;;  %vm27_vm0 = vcmask 261120   ;;  %v24_v1 = vld [vmem:[#allocation2 + $0x8] sm:$0xff]  ;;  %s112_s0 = smov [#allocation5]  }
   0xf   :  { %v25_v2 = vmul.f32 %v23_v0, %v23_v0  ;;  %v26_v3 = vmul.f32 %v24_v1, %v24_v1  ;;  %s45_s13 = sshll.u32 %s112_s0, 4  ;;  %s46_s13 = int_to_ptr.vmem [resolvable:$true] %s45_s13 }
  0x10   :  { %s85_s14 = scalar_lea.vmem %s46_s13, 256  ;;  %p90_p6 = scmp.lt.s32.totalorder %s46_s13, %s46_s13 }
  0x11   :  { %v28_v4 = vsel %vm27_vm0, %v25_v2, 0.0  ;;  %v31_v5 = vsel %vm27_vm0, %v26_v3, 0.0  ;;  %p86_p5 = scmp.ne.s32.totalorder %s46_s13, %s85_s14  ;;  %p91_p7 = scmp.lt.s32.totalorder %s85_s14, %s85_s14 }
  0x12   :  { %29 = vadd.xlane.f32.xlu0 %v28_v4 }
  0x13   :  { %p92_p8 = por %p91_p7, %p90_p6 }
  0x15   :  { %p93_p9 = pnand %p92_p8, %p86_p5 }
  0x16   :  { %32 = vadd.xlane.f32.xlu0 %v31_v5 }
  0x9b   :  { %v30_v6 = vpop.xlane.xlu0 %29 }
  0x9c   :  { %61 = vrsqrt.f32 %v30_v6 }
  0x9f   :  { %v33_v7 = vpop.xlane.xlu0 %32 }
  0xa0   :  { %63 = vrsqrt.f32 %v33_v7 }
  0xa9   :  { %v62_v8 = vpop.eup %61 }
  0xaa   :  { %v36_v9 = vmul.f32 %v62_v8, %v23_v0 }
  0xac   :  { %38 = vst.msk [vmem:[#allocation5] sm:$0xff] %vm27_vm0, %v36_v9 }
  0xad   :  { %v64_v10 = vpop.eup %63 }
  0xae   :  { %v37_v11 = vmul.f32 %v64_v10, %v24_v1 }
  0xb0   :  { %39 = vst.msk [vmem:[#allocation5 + $0x8] sm:$0xff] %vm27_vm0, %v37_v11 }
  0xb1   :  { %96 = shalt.err (!%p93_p9)
}
  0xb2   :  { %51 = dma.vmem_to_hbm [thread:$0]  %s46_s13, 256, %s140_s1, [#allocation4], %s110_s9, %s110_s9, %s111_s10  }
  0xb3   :  { %107 = dma.done.wait [#allocation4], 256  }
  0xb4   :  { %108 = vsyncadd [#allocation4], 4294967040 }
  0xb5   :  { %55 = vsyncpa [#allocation3], 1 }
  0xb6   :  { %56 = vsyncpa [#allocation4], 1 }

</bundles_post_ra>
